<compile_context>
chip_gen: v7x
topology: tpu7x:2x2x1
jax: 0.10.0
libtpu: 0.0.40
codegen_flags: <defaults>
</compile_context>

<pallas_src>
import functools

import jax
import jax.numpy as jnp
from jax.experimental import pallas as pl
from jax.experimental.pallas import tpu as pltpu

EPS = 1e-5
LANE = 128


def _round_up(n, m):
    return ((n + m - 1) // m) * m


# ------------------------------ kernels ---------------------------------------

def _store_moments(mom_ref, h_bf, n_valid):
    """Write per-tile [sum(h); sum(h*h)] (rows beyond n_valid masked out)."""
    tb = h_bf.shape[0]
    hf = h_bf.astype(jnp.float32)
    row = (jax.lax.broadcasted_iota(jnp.int32, (tb, 1), 0)
           + pl.program_id(0) * tb)
    valid = (row < n_valid).astype(jnp.float32)
    hm = hf * valid
    s1 = jnp.sum(hm, axis=0, keepdims=True)          # (1, Hp)
    s2 = jnp.sum(hm * hf, axis=0, keepdims=True)     # (1, Hp)
    mom_ref[...] = jnp.concatenate([s1, s2], axis=0)[None]   # (1, 2, Hp)


def _enc_layer1_kernel(n_valid, x_ref, w_ref, b_ref, h_ref, mom_ref):
    """h1 = relu(x @ W1 + b1); emit bf16 h1 tile + BN1 partial moments."""
    h = jnp.dot(x_ref[...], w_ref[...], preferred_element_type=jnp.float32)
    h = jnp.maximum(h + b_ref[...], 0.0)
    hb = h.astype(jnp.bfloat16)
    h_ref[...] = hb
    _store_moments(mom_ref, hb, n_valid)


def _enc_layer2_kernel(n_valid, h_in_ref, sc_ref, sh_ref, w_ref, b_ref,
                       h_ref, mom_ref):
    """a1 = BN1(h1); h2 = relu(a1 @ W2 + b2); emit bf16 h2 + BN2 moments."""
    a = (h_in_ref[...].astype(jnp.float32) * sc_ref[...]
         + sh_ref[...]).astype(jnp.bfloat16)
    h = jnp.dot(a, w_ref[...], preferred_element_type=jnp.float32)
    h = jnp.maximum(h + b_ref[...], 0.0)
    hb = h.astype(jnp.bfloat16)
    h_ref[...] = hb
    _store_moments(mom_ref, hb, n_valid)


def _enc_head_kernel(h_in_ref, sc_ref, sh_ref, wh_ref, bh_ref, y_ref):
    """a2 = BN2(h2); y = a2 @ [Wm|Ws] + [bm|bs]; softplus on the scale half."""
    a = (h_in_ref[...].astype(jnp.float32) * sc_ref[...]
         + sh_ref[...]).astype(jnp.bfloat16)
    y = jnp.dot(a, wh_ref[...], preferred_element_type=jnp.float32) + bh_ref[...]
    dp = y_ref.shape[1] // 2
    # Lane-select instead of slicing: one full-width lane-dense store, no
    # materialized sub-slices. softplus = max(x,0) + log1p(exp(-|x|)) (EUP).
    lane = jax.lax.broadcasted_iota(jnp.int32, y.shape, 1)
    sp = jnp.maximum(y, 0.0) + jnp.log1p(jnp.exp(-jnp.abs(y)))
    y_ref[...] = jnp.where(lane >= dp, sp, y)


# --------------------------- params & packing ----------------------------------

def init_params(key, input_dim, output_dim, hidden_dim=128):
    """PyTorch-equivalent f32 params: Linear default init U(-1/sqrt(fan_in), +)."""
    ks = jax.random.split(key, 8)

    def linear(kw, kb, fan_in, fan_out):
        bound = 1.0 / (fan_in ** 0.5)
        w = jax.random.uniform(kw, (fan_in, fan_out), jnp.float32, -bound, bound)
        b = jax.random.uniform(kb, (1, fan_out), jnp.float32, -bound, bound)
        return w, b

    w1, b1 = linear(ks[0], ks[1], input_dim, hidden_dim)
    w2, b2 = linear(ks[2], ks[3], hidden_dim, hidden_dim)
    wm, bm = linear(ks[4], ks[5], hidden_dim, output_dim)
    ws, bs = linear(ks[6], ks[7], hidden_dim, output_dim)
    g1 = jnp.ones((1, hidden_dim), jnp.float32)
    be1 = jnp.zeros((1, hidden_dim), jnp.float32)
    g2 = jnp.ones((1, hidden_dim), jnp.float32)
    be2 = jnp.zeros((1, hidden_dim), jnp.float32)
    return dict(w1=w1, b1=b1, g1=g1, be1=be1,
                w2=w2, b2=b2, g2=g2, be2=be2,
                wm=wm, bm=bm, ws=ws, bs=bs)


def pack_params(p, input_dim, hidden_dim, output_dim):
    """Pad feature dims (input to 16-sublane, hidden/output to 128-lane),
    cast matmul weights to bf16, fuse the two heads into one [mean|scale] slab.
    Pad fills: weights/biases/beta -> 0, gamma -> 1 (keeps dead lanes exactly 0)."""
    Ip = _round_up(input_dim, 16)      # layer-1 K: sublane multiple only
    Hp = _round_up(hidden_dim, LANE)
    Dp = _round_up(output_dim, LANE)

    def pad2(a, r, c, fill=0.0):
        return jnp.pad(a, ((0, r - a.shape[0]), (0, c - a.shape[1])),
                       constant_values=fill)

    w1 = pad2(p["w1"], Ip, Hp).astype(jnp.bfloat16)
    w2 = pad2(p["w2"], Hp, Hp).astype(jnp.bfloat16)
    wh = jnp.concatenate([pad2(p["wm"], Hp, Dp), pad2(p["ws"], Hp, Dp)],
                         axis=1).astype(jnp.bfloat16)

    b1 = pad2(p["b1"], 1, Hp)
    b2 = pad2(p["b2"], 1, Hp)
    g1 = pad2(p["g1"], 1, Hp, fill=1.0)
    g2 = pad2(p["g2"], 1, Hp, fill=1.0)
    be1 = pad2(p["be1"], 1, Hp)
    be2 = pad2(p["be2"], 1, Hp)
    bh = jnp.concatenate([pad2(p["bm"], 1, Dp), pad2(p["bs"], 1, Dp)], axis=1)

    return dict(w1=w1, b1=b1, g1=g1, be1=be1,
                w2=w2, b2=b2, g2=g2, be2=be2,
                wh=wh, bh=bh)


# ------------------------------- wrapper ---------------------------------------

def _fold_bn(mom, gamma, beta, n):
    """Fold batch stats + affine into (scale, shift): bn(h) = h*scale + shift."""
    s = jnp.sum(mom, axis=0)                       # (2, Hp)
    mu = s[0:1, :] / n
    ex2 = s[1:2, :] / n
    var = jnp.maximum(ex2 - mu * mu, 0.0)
    scale = gamma * jax.lax.rsqrt(var + EPS)
    shift = beta - mu * scale
    return scale, shift


def _vmem_limit_bytes(packed, tb, ip, hp, dp2):
    """Generation-aware scoped-VMEM request sized from the real footprint."""
    try:
        cap = int(pltpu.get_tpu_info().vmem_capacity_bytes)
    except Exception:  # pragma: no cover - emulator / older jax fallback
        cap = 64 << 20
    weights = sum(int(a.size) * a.dtype.itemsize for a in packed.values())
    # per-tile: x(bf16) + h in/out (bf16, 2 buffers each) + y(f32) + f32 temps
    tile = tb * (2 * ip + 4 * 2 * hp + 4 * dp2 + 6 * 4 * hp)
    need = 2 * weights + 2 * tile + (2 << 20)
    return int(min(max(need, 4 << 20), cap // 2))


def encoder_forward(x, packed, output_dim, batch_tile=None):
    """x: (B, input_dim) f32. packed: pack_params(...) output."""
    B, input_dim = x.shape
    Ip, Hp = packed["w1"].shape
    Dp2 = packed["wh"].shape[1]
    Dp = Dp2 // 2

    # Batch tiling: >=256 rows at production batch (MXU M-occupancy), else the
    # (16-rounded) batch. bf16 tiles want 16-row sublane multiples.
    if batch_tile is None:
        batch_tile = 256 if B >= 256 else _round_up(B, 16)
    TB = int(batch_tile)
    assert TB % 16 == 0, "batch_tile must be a multiple of 16 (bf16 sublanes)"
    B_pad = _round_up(B, TB)
    n_tiles = B_pad // TB

    x_p = jnp.pad(x, ((0, B_pad - B), (0, Ip - input_dim))).astype(jnp.bfloat16)

    cparams = pltpu.CompilerParams(
        dimension_semantics=("parallel",),
        vmem_limit_bytes=_vmem_limit_bytes(packed, TB, Ip, Hp, Dp2))

    def full(shape):  # VMEM-resident across the grid (constant block index)
        return pl.BlockSpec(shape, lambda i, _n=len(shape): (0,) * _n)

    def row_blk(cols):  # batch-tiled, double-buffered
        return pl.BlockSpec((TB, cols), lambda i: (i, 0))

    mom_spec = pl.BlockSpec((1, 2, Hp), lambda i: (i, 0, 0))

    # --- pass 1: Linear(input_dim, hidden) + ReLU, emit h1 + BN1 moments ---
    h1, mom1 = pl.pallas_call(
        functools.partial(_enc_layer1_kernel, B),
        grid=(n_tiles,),
        in_specs=[row_blk(Ip), full((Ip, Hp)), full((1, Hp))],
        out_specs=(row_blk(Hp), mom_spec),
        out_shape=(jax.ShapeDtypeStruct((B_pad, Hp), jnp.bfloat16),
                   jax.ShapeDtypeStruct((n_tiles, 2, Hp), jnp.float32)),
        compiler_params=cparams,
    )(x_p, packed["w1"], packed["b1"])
    sc1, sh1 = _fold_bn(mom1, packed["g1"], packed["be1"], B)

    # --- pass 2: BN1 + Linear(hidden, hidden) + ReLU, emit h2 + BN2 moments ---
    h2, mom2 = pl.pallas_call(
        functools.partial(_enc_layer2_kernel, B),
        grid=(n_tiles,),
        in_specs=[row_blk(Hp), full((1, Hp)), full((1, Hp)),
                  full((Hp, Hp)), full((1, Hp))],
        out_specs=(row_blk(Hp), mom_spec),
        out_shape=(jax.ShapeDtypeStruct((B_pad, Hp), jnp.bfloat16),
                   jax.ShapeDtypeStruct((n_tiles, 2, Hp), jnp.float32)),
        compiler_params=cparams,
    )(h1, sc1, sh1, packed["w2"], packed["b2"])
    sc2, sh2 = _fold_bn(mom2, packed["g2"], packed["be2"], B)

    # --- pass 3: BN2 + fused [mean | scale] head, softplus in-kernel ---
    y = pl.pallas_call(
        _enc_head_kernel,
        grid=(n_tiles,),
        in_specs=[row_blk(Hp), full((1, Hp)), full((1, Hp)),
                  full((Hp, Dp2)), full((1, Dp2))],
        out_specs=row_blk(Dp2),
        out_shape=jax.ShapeDtypeStruct((B_pad, Dp2), jnp.float32),
        compiler_params=cparams,
    )(h2, sc2, sh2, packed["wh"], packed["bh"])

    return y[:B, :output_dim], y[:B, Dp:Dp + output_dim]


# ------------------------- pure-JAX references --------------------------------

def encoder_reference_bf16(x, p):
    """Mirror of the kernel math (bf16 matmul operands & inter-layer
    activations, f32 acc, one-pass biased variance, training-mode BN)."""
    bf = jnp.bfloat16

    def stats(hf):
        mu = jnp.mean(hf, axis=0, keepdims=True)
        ex2 = jnp.mean(hf * hf, axis=0, keepdims=True)
        return mu, jnp.maximum(ex2 - mu * mu, 0.0)

    def bn_apply(hf, g, be):
        mu, var = stats(hf)
        scale = g * jax.lax.rsqrt(var + EPS)
        return (hf * scale + (be - mu * scale)).astype(bf)

    h1 = jnp.maximum(jnp.dot(x.astype(bf), p["w1"].astype(bf),
                             preferred_element_type=jnp.float32) + p["b1"], 0.0)
    h1f = h1.astype(bf).astype(jnp.float32)
    a1 = bn_apply(h1f, p["g1"], p["be1"])

    h2 = jnp.maximum(jnp.dot(a1, p["w2"].astype(bf),
                             preferred_element_type=jnp.float32) + p["b2"], 0.0)
    h2f = h2.astype(bf).astype(jnp.float32)
    a2 = bn_apply(h2f, p["g2"], p["be2"])

    m = jnp.dot(a2, p["wm"].astype(bf),
                preferred_element_type=jnp.float32) + p["bm"]
    s_lin = jnp.dot(a2, p["ws"].astype(bf),
                    preferred_element_type=jnp.float32) + p["bs"]
    return m, jax.nn.softplus(s_lin)


def encoder_reference_f32(x, p):
    """Exact f32 PyTorch-style reference (training-mode BN, centered variance)."""
    def bn(h):
        mu = jnp.mean(h, axis=0, keepdims=True)
        var = jnp.mean((h - mu) ** 2, axis=0, keepdims=True)
        return (h - mu) * jax.lax.rsqrt(var + EPS)

    h = jnp.maximum(x @ p["w1"] + p["b1"], 0.0)
    h = p["g1"] * bn(h) + p["be1"]
    h = jnp.maximum(h @ p["w2"] + p["b2"], 0.0)
    h = p["g2"] * bn(h) + p["be2"]
    m = h @ p["wm"] + p["bm"]
    s = jax.nn.softplus(h @ p["ws"] + p["bs"])
    return m, s


if __name__ == "__main__":
    # hidden_dim=128 is both the module default and the TPU lane width.
    # B=40 with batch_tile=16 exercises a 3-step grid plus row masking.
    B, INPUT_DIM, HIDDEN_DIM, OUTPUT_DIM = 40, 16, 128, 8

    key = jax.random.PRNGKey(0)
    kx, kp = jax.random.split(key)
    x = jax.random.normal(kx, (B, INPUT_DIM), jnp.float32)
    params = init_params(kp, INPUT_DIM, OUTPUT_DIM, HIDDEN_DIM)
    packed = pack_params(params, INPUT_DIM, HIDDEN_DIM, OUTPUT_DIM)

    mean, scale = encoder_forward(x, packed, OUTPUT_DIM, batch_tile=16)
    jax.block_until_ready((mean, scale))

    assert mean.shape == (B, OUTPUT_DIM) and scale.shape == (B, OUTPUT_DIM)
    assert bool(jnp.all(scale > 0.0))

    # Tight check vs a pure-JAX mirror of the kernel math.
    m_ref, s_ref = encoder_reference_bf16(x, params)
    assert jnp.allclose(mean, m_ref, atol=1e-3, rtol=1e-3), \
        float(jnp.max(jnp.abs(mean - m_ref)))
    assert jnp.allclose(scale, s_ref, atol=1e-3, rtol=1e-3), \
        float(jnp.max(jnp.abs(scale - s_ref)))

    # Loose sanity check vs exact f32 module semantics (bounds bf16 matmul +
    # bf16 activation-roundtrip deviation; batch-stat BN can amplify rounding
    # on near-degenerate columns, hence the generous tolerance).
    m_f32, s_f32 = encoder_reference_f32(x, params)
    assert jnp.allclose(mean, m_f32, atol=5e-1, rtol=5e-1)
    assert jnp.allclose(scale, s_f32, atol=5e-1, rtol=5e-1)

    print("KERNEL_OK")
</pallas_src>

<mosaic_0001>
module attributes {stable_mosaic.version = 11 : i64} {
  func.func @_enc_layer1_kernel(%arg0: i32, %arg1: memref<16x16xbf16, #tpu.memory_space<vmem>>, %arg2: memref<16x128xbf16, #tpu.memory_space<vmem>>, %arg3: memref<1x128xf32, #tpu.memory_space<vmem>>, %arg4: memref<16x128xbf16, #tpu.memory_space<vmem>>, %arg5: memref<1x2x128xf32, #tpu.memory_space<vmem>>) attributes {dimension_semantics = [#tpu.dimension_semantics<parallel>], iteration_bounds = array<i64: 3>, scalar_prefetch = 0 : i64, scratch_operands = 0 : i64, tpu.core_type = #tpu.core_type<tc>, window_params = [{transform_indices = @transform_0, window_bounds = array<i64: 16, 16>}, {pipeline_mode = #tpu.pipeline_mode<synchronous>, transform_indices = @transform_1, window_bounds = array<i64: 16, 128>}, {pipeline_mode = #tpu.pipeline_mode<synchronous>, transform_indices = @transform_2, window_bounds = array<i64: 1, 128>}, {transform_indices = @transform_3, window_bounds = array<i64: 16, 128>}, {transform_indices = @transform_4, window_bounds = array<i64: 1, 2, 128>}]} {
    %c0 = arith.constant 0 : index
    %c0_0 = arith.constant 0 : index
    %0 = vector.load %arg1[%c0, %c0_0] : memref<16x16xbf16, #tpu.memory_space<vmem>>, vector<16x16xbf16>
    %c0_1 = arith.constant 0 : index
    %c0_2 = arith.constant 0 : index
    %1 = vector.load %arg2[%c0_1, %c0_2] : memref<16x128xbf16, #tpu.memory_space<vmem>>, vector<16x128xbf16>
    %cst = arith.constant dense<0.000000e+00> : vector<16x128xf32>
    %2 = tpu.matmul %0, %1, %cst {dimension_numbers = #tpu.dot_dimension_numbers<[1], [0], [0], [1], [0, 0, 1, 1], [], []>} : vector<16x16xbf16>, vector<16x128xbf16>, vector<16x128xf32> -> vector<16x128xf32>
    %c0_3 = arith.constant 0 : index
    %c0_4 = arith.constant 0 : index
    %3 = vector.load %arg3[%c0_3, %c0_4] : memref<1x128xf32, #tpu.memory_space<vmem>>, vector<1x128xf32>
    %4 = vector.broadcast %3 : vector<1x128xf32> to vector<16x128xf32>
    %5 = arith.addf %2, %4 : vector<16x128xf32>
    %cst_5 = arith.constant 0.000000e+00 : f32
    %6 = vector.broadcast %cst_5 : f32 to vector<16x128xf32>
    %7 = arith.maximumf %5, %6 : vector<16x128xf32>
    %8 = arith.truncf %7 : vector<16x128xf32> to vector<16x128xbf16>
    %c0_6 = arith.constant 0 : index
    %c0_7 = arith.constant 0 : index
    %9 = vector.load %arg4[%c0_6, %c0_7] : memref<16x128xbf16, #tpu.memory_space<vmem>>, vector<16x128xbf16>
    tpu.vector_store %arg4[%c0_6, %c0_7], %8 {strides = array<i32>} : memref<16x128xbf16, #tpu.memory_space<vmem>>, vector<16x128xbf16>,
    %10 = arith.extf %8 : vector<16x128xbf16> to vector<16x128xf32>
    %11 = tpu.iota {dimensions = array<i32: 0>} : vector<16x1xi32>
    %c16_i32 = arith.constant 16 : i32
    %12 = arith.muli %arg0, %c16_i32 : i32
    %13 = vector.broadcast %12 : i32 to vector<16x1xi32>
    %14 = arith.addi %11, %13 : vector<16x1xi32>
    %c40_i32 = arith.constant 40 : i32
    %15 = vector.broadcast %c40_i32 : i32 to vector<16x1xi32>
    %16 = arith.cmpi slt, %14, %15 : vector<16x1xi32>
    %17 = arith.extui %16 : vector<16x1xi1> to vector<16x1xi32>
    %18 = arith.sitofp %17 : vector<16x1xi32> to vector<16x1xf32>
    %19 = vector.broadcast %18 : vector<16x1xf32> to vector<16x128xf32>
    %20 = arith.mulf %10, %19 : vector<16x128xf32>
    %cst_8 = arith.constant dense<0.000000e+00> : vector<128xf32>
    %21 = vector.multi_reduction <add>, %20, %cst_8 [0] : vector<16x128xf32> to vector<128xf32>
    %22 = vector.shape_cast %21 : vector<128xf32> to vector<1x128xf32>
    %23 = arith.mulf %20, %10 : vector<16x128xf32>
    %cst_9 = arith.constant dense<0.000000e+00> : vector<128xf32>
    %24 = vector.multi_reduction <add>, %23, %cst_9 [0] : vector<16x128xf32> to vector<128xf32>
    %25 = vector.shape_cast %24 : vector<128xf32> to vector<1x128xf32>
    %26 = tpu.concatenate %22, %25 in 0 : vector<1x128xf32>, vector<1x128xf32> -> vector<2x128xf32>
    %27 = vector.shape_cast %26 : vector<2x128xf32> to vector<1x2x128xf32>
    %c0_10 = arith.constant 0 : index
    %c0_11 = arith.constant 0 : index
    %c0_12 = arith.constant 0 : index
    %28 = vector.load %arg5[%c0_10, %c0_11, %c0_12] : memref<1x2x128xf32, #tpu.memory_space<vmem>>, vector<1x2x128xf32>
    tpu.vector_store %arg5[%c0_10, %c0_11, %c0_12], %27 {strides = array<i32>} : memref<1x2x128xf32, #tpu.memory_space<vmem>>, vector<1x2x128xf32>,
    return
  }
  func.func @transform_0(%arg0: i32) -> (i32, i32) {
    %c0_i32 = arith.constant 0 : i32
    %c0_i32_0 = arith.constant 0 : i32
    return %arg0, %c0_i32 : i32, i32
  }
  func.func @transform_1(%arg0: i32) -> (i32, i32) {
    %c0_i32 = arith.constant 0 : i32
    %c0_i32_0 = arith.constant 0 : i32
    %c0_i32_1 = arith.constant 0 : i32
    return %c0_i32, %c0_i32_0 : i32, i32
  }
  func.func @transform_2(%arg0: i32) -> (i32, i32) {
    %c0_i32 = arith.constant 0 : i32
    %c0_i32_0 = arith.constant 0 : i32
    %c0_i32_1 = arith.constant 0 : i32
    return %c0_i32, %c0_i32_0 : i32, i32
  }
  func.func @transform_3(%arg0: i32) -> (i32, i32) {
    %c0_i32 = arith.constant 0 : i32
    %c0_i32_0 = arith.constant 0 : i32
    return %arg0, %c0_i32 : i32, i32
  }
  func.func @transform_4(%arg0: i32) -> (i32, i32, i32) {
    %c0_i32 = arith.constant 0 : i32
    %c0_i32_0 = arith.constant 0 : i32
    %c0_i32_1 = arith.constant 0 : i32
    return %arg0, %c0_i32, %c0_i32_0 : i32, i32, i32
  }
}

</mosaic_0001>

<bundles_post_ra>
// kernel: tpu_custom_call.1
= control target key start
LH: loop header
LB: loop body
LE: loop exit
PB: predicated region body
PF: predicated region fallthrough
CT: control target
= control target key end

     0   :  { %10 = vsyncpa [#allocation3], 0  ;;  %s812_s0 = inlined_call_operand.vmem [shape: bf16[48,16], index: 0, kind: input, shape index: {}]   ;;  %s813_s1 = inlined_call_operand.vmem [shape: bf16[16,128], index: 1, kind: input, shape index: {}]   ;;  %s814_s2 = inlined_call_operand.vmem [shape: f32[1,128], index: 2, kind: input, shape index: {}]   ;;  %s815_s3 = inlined_call_operand.hbm [shape: bf16[48,128], index: 3, kind: output, shape index: {0}]   ;;  %s816_s4 = inlined_call_operand.hbm [shape: f32[3,2,128], index: 4, kind: output, shape index: {1}]  }
   0x1   :  { %12 = vsyncpa [#allocation3 + $0x1], 0 }
   0x2   :  { %13 = vsyncpa [#allocation5], 0 }
   0x3   :  { %15 = vsyncpa [#allocation5 + $0x1], 0  ;;  %s669_s15 = smov 0   ;;  %s671_s16 = smov 0  }
   0x4   :  { %s673_s17 = smov 0   ;;  %s675_s18 = smov 0  }
   0x5 LB: > { %s690_s19 = sadd.s32 4294967295, %s636_s18   ;;  %s452_s20 = sadd.s32 4294967294, %s636_s18   ;;  %s636_s18 = sphi %s675_s18, %s822_s18   ;;  %s632_s17 = sphi %s673_s17, %s821_s17   ;;  %s628_s16 = sphi %s671_s16, %s820_s16   ;;  %s624_s15 = sphi %s669_s15, %s819_s15  }
   0x6   : > { %s694_s21 = sadd.s32 1, %s636_s18   ;;  %s96_s22 = sadd.s32 1, %s632_s17 }
   0x7   : > { %s93_s23 = ssub.s32 %s636_s18, %s694_s21  ;;  %p106_p0 = scmp.ne.s32.totalorder %s632_s17, %s628_s16 }
   0x8   : > { %p94_p1 = scmp.eq.s32.totalorder %s93_s23, 0  ;;  %p107_p2 = scmp.eq.s32.totalorder %s690_s19, 2 }
   0x9   : > { %p112_p3 = scmp.ne.s32.totalorder %s628_s16, %s624_s15  ;;  %p113_p4 = scmp.eq.s32.totalorder %s452_s20, 2 }
   0xa   : > { %s705_s24 = scalar_select %p94_p1, %s632_s17, %s96_s22  }
   0xb   : > { %p707_p5 = por %p107_p2, %p106_p0  ;;  %p711_p6 = por %p113_p4, %p112_p3 }
   0xc   : > { %p455_p7 = scmp.ge.s32.totalorder %s636_s18, 1  ;;  %p172_p8 = scmp.lt.s32.totalorder %s636_s18, 4 }
   0xe   : > { %p173_p9 = pnand %p455_p7, %p172_p8 }
   0xf   : > { %v638_v0 = vmov (!%p173_p9), 0.0   ;;  %v540_v1 = vld [vmem:[%s813_s1] sm:$0xff] (!%p173_p9)   ;;  %s458_s29 = sshll.u32 (!%p173_p9), %s690_s19, 1  ;;  %vm639_vm0 = vmmov (!%p173_p9), 0   ;;  %vm233_vm1 = vcmask (!%p173_p9), 130048   ;;  %v292_v3 = vlaneseq (!%p173_p9)  ;;  %s466_s8 = sshll.u32 (!%p173_p9), %s690_s19, 4 }
  0x10   : > { %176 = sbr.rel (%p173_p9) target bundleno = 293 (0x125), region = 32  ;;  %486 = vmatprep.subr.bf16.mxu0 (!%p173_p9), %v638_v0  ;;  %488 = vmatprep.mubr.msk.bf16.mxu0 (!%p173_p9), %vm639_vm0, %v638_v0  ;;  %p204_p10 = scmp.lt.s32.totalorder (!%p173_p9), %s458_s29, 5  ;;  %v296_v6 = vstv (!%p173_p9), %s466_s8  ;;  %v460_v7 = vld [vmem:[%s814_s2] ss:$0 sm:$0xff] (!%p173_p9) }
  0x11   : > { %487 = vmatpush3.bf16.msra.mxu0 (!%p173_p9), %v540_v1  ;;  %v293_v4 = vshrl.u32 (!%p173_p9), %v292_v3, 7  ;;  %s726_s9 = sand.u32 (!%p173_p9), 1, %s628_s16   ;;  %s478_s13 = sshll.u32 (!%p173_p9), %s690_s19, 7 }
  0x12   : > { %s456_s12 = sshll.u32 (!%p173_p9), %s726_s9, 3  ;;  %s736_s27 = scalar_lea.hbm (!%p173_p9), %s815_s3, %s478_s13 }
  0x13   : > { %v294_v5 = vadd.s32 (!%p173_p9), 8, %v293_v4  ;;  %v297_v9 = vadd.s32 (!%p173_p9), %v296_v6, %v293_v4  ;;  %s195_s14 = scalar_lea.vmem (!%p173_p9), [#allocation2], %s456_s12  ;;  %s327_s28 = scalar_lea.sflag (!%p173_p9), [#allocation3], %s726_s9 }
  0x14   : > { %s345_s20 = sshll.u32 (!%p173_p9), %s195_s14, 4  ;;  %s738_s20 = int_to_ptr.vmem [resolvable:$true] %s345_s20 }
  0x15   : > { %v298_v10 = vadd.s32 (!%p173_p9), %v296_v6, %v294_v5  ;;  %vm299_vm2 = vcmp.lt.s32.totalorder (!%p173_p9), %v297_v9, 40 }
  0x16   : > { %v467_v19 = vsel (!%p173_p9), %vm299_vm2, 1.0, %v638_v0 }
  0x17   : > { %s824_s29 = smov (!%p204_p10, %s458_s29), 5  ;;  %vm300_vm3 = vcmp.lt.s32.totalorder %v298_v10, 40 }
  0x18   : > { %s459_s30 = sshll.u32 %s824_s29, 2  ;;  %v468_v20 = vsel %vm300_vm3, 1.0, %v638_v0  ;;  %s542_s29 = scalar_lea.vmem %s738_s20, 128 }
  0x19   : > { %s207_s7 = scalar_lea.vmem %s812_s0, %s459_s30  ;;  %p543_p11 = scmp.ne.s32.totalorder %s738_s20, %s542_s29 }
  0x1a   : > { %v541_v2 = vld [vmem:[%s207_s7] sm:$0xff]   ;;  %s640_s30 = smov [#allocation2]  }
  0x1b   : > { %489 = vmatmul.mubr.msk.bf16.vlgmr.msra.gmra.mrb[0].mxu0 %vm233_vm1, %v541_v2  ;;  %p544_p12 = pnand %p543_p11, %p707_p5  ;;  %s546_s5 = sshll.u32 %s640_s30, 4  ;;  %s547_s5 = int_to_ptr.vmem [resolvable:$false] %s546_s5 }
  0x1c   : > { %s548_s6 = scalar_lea.vmem %s547_s5, 256  ;;  %p549_p0 = scmp.lt.s32.totalorder %s738_s20, %s547_s5 }
  0x1d   : > { %p545_p13 = pneg %p544_p12  ;;  %p550_p1 = scmp.lt.s32.totalorder %s548_s6, %s542_s29 }
  0x1f   : > { %p551_p2 = por %p550_p1, %p549_p0 }
  0x21   : > { %p552_p3 = pnand %p551_p2, %p545_p13 }
  0xee   : > { %v271_v8 = vpop.f32.mrb[0].mxu0 }
  0xef   : > { %v272_v11 = vadd.f32 %v460_v7, %v271_v8  ;;  %v490_v12 = vpop.f32.mrb[1].mxu0 }
  0xf0   : > { %v274_v13 = vpop.f32.mrb[2].mxu0 }
  0xf1   : > { %v275_v14 = vadd.f32 %v460_v7, %v274_v13  ;;  %v491_v15 = vpop.f32.mrb[3].mxu0  ;;  %v278_v16 = vmax.f32 %v272_v11, 0.0 }
  0xf3   : > { %v279_v17 = vmax.f32 %v275_v14, 0.0 }
  0xf5   : > { %v280_v18 = vpack.c.bf16 %v279_v17, %v278_v16 }
  0xf7   : > { %483 = vst [vmem:[%s195_s14] sm:$0xff] %v280_v18   ;;  %v290_v21 = vunpack.c.l.bf16 %v280_v18  ;;  %v291_v22 = vunpack.c.h.bf16 %v280_v18 }
  0xf8   : > { %555 = shalt.err (!%p552_p3)
}
  0xf9   : > { %s556_s7 = scalar_lea.hbm %s736_s27, 128  ;;  %s560_s11 = scalar_lea.hbm %s815_s3, 384 }
  0xfa   : > { %p557_p4 = scmp.ne.s32.totalorder %s736_s27, %s556_s7  ;;  %p561_p9 = scmp.lt.u32.totalorder %s736_s27, %s815_s3 }
  0xfb   : > { %p562_p10 = scmp.lt.u32.totalorder %s560_s11, %s556_s7  ;;  %p564_p12 = scmp.lt.u32.totalorder %s556_s7, %s736_s27 }
  0xfc   : > { %p558_p7 = pnand %p557_p4, %p707_p5 }
  0xfd   : > { %p563_p11 = por %p562_p10, %p561_p9 }
  0xfe   : > { %p559_p8 = pneg %p558_p7 }
  0xff   : > { %p565_p13 = por %p564_p12, %p563_p11 }
 0x101   : > { %p566_p0 = pnand %p565_p13, %p559_p8 }
 0x103   : > { %569 = shalt.err (!%p566_p0)
}
 0x104   : > { %s641_s14 = smov 64   ;;  %s642_s22 = smov 4   ;;  %v305_v23 = vmul.f32 %v467_v19, %v290_v21  ;;  %v306_v24 = vmul.f32 %v468_v20, %v291_v22  ;;  %vm323_vm4 = vcmask 1040384  }
 0x105   : > { %492 = dma.vmem_to_hbm [thread:$0]  (%p707_p5), %s738_s20, 128, %s736_s27, %s327_s28, %s641_s14, %s641_s14, %s642_s22  }
 0x106   : > { %v307_v25 = vadd.f32 %v306_v24, %v305_v23  ;;  %v314_v26 = vmul.f32 %v305_v23, %v290_v21  ;;  %v315_v27 = vmul.f32 %v306_v24, %v291_v22  ;;  %s457_s23 = sshll.u32 %s726_s9, 1  ;;  %s473_s20 = sshll.u32 %s690_s19, 5 }
 0x107   : > { %s202_s27 = scalar_lea.vmem [#allocation4], %s457_s23  ;;  %s769_s5 = scalar_lea.hbm %s816_s4, %s473_s20 }
 0x108   : > { %v308_v28 = vrot.slane %v307_v25, 4  ;;  %v316_v29 = vadd.f32 %v315_v27, %v314_v26  ;;  %s361_s28 = sshll.u32 %s202_s27, 4  ;;  %s332_s6 = scalar_lea.sflag [#allocation5], %s726_s9  ;;  %s771_s28 = int_to_ptr.vmem [resolvable:$true] %s361_s28 }
 0x109   : > { %s570_s7 = scalar_lea.vmem %s771_s28, 32  ;;  %s643_s19 = smov [#allocation4]  }
 0x10a   : > { %v317_v30 = vrot.slane %v316_v29, 4  ;;  %v309_v31 = vadd.f32 %v308_v28, %v307_v25  ;;  %p571_p1 = scmp.ne.s32.totalorder %s771_s28, %s570_s7  ;;  %s574_s8 = sshll.u32 %s643_s19, 4  ;;  %s575_s8 = int_to_ptr.vmem [resolvable:$false] %s574_s8 }
 0x10b   : > { %s576_s10 = scalar_lea.vmem %s575_s8, 64  ;;  %p577_p4 = scmp.lt.s32.totalorder %s771_s28, %s575_s8 }
 0x10c   : > { %v310_v32 = vrot.slane %v309_v31, 2  ;;  %v318_v33 = vadd.f32 %v317_v30, %v316_v29  ;;  %p572_p2 = pnand %p571_p1, %p707_p5  ;;  %p578_p7 = scmp.lt.s32.totalorder %s576_s10, %s570_s7 }
 0x10e   : > { %v311_v34 = vadd.f32 %v310_v32, %v309_v31  ;;  %v319_v35 = vrot.slane %v318_v33, 2  ;;  %p573_p3 = pneg %p572_p2  ;;  %p579_p8 = por %p578_p7, %p577_p4 }
 0x110   : > { %v312_v36 = vrot.slane %v311_v34, 1  ;;  %v320_v37 = vadd.f32 %v319_v35, %v318_v33  ;;  %p580_p9 = pnand %p579_p8, %p573_p3 }
 0x112   : > { %v321_v38 = vrot.slane %v320_v37, 1  ;;  %v313_v39 = vadd.f32 %v312_v36, %v311_v34 }
 0x114   : > { %v322_v40 = vadd.f32 %v321_v38, %v320_v37 }
 0x116   : > { %v324_v41 = vsel %vm323_vm4, %v313_v39, %v322_v40 }
 0x117   : > { %325 = vst [vmem:[%s202_s27] sm:$0x3] %v324_v41 }
 0x118   : > { %583 = shalt.err (!%p580_p9)
}
 0x119   : > { %s584_s9 = scalar_lea.hbm %s769_s5, 32  ;;  %s588_s13 = scalar_lea.hbm %s816_s4, 96 }
 0x11a   : > { %p585_p10 = scmp.ne.s32.totalorder %s769_s5, %s584_s9  ;;  %p589_p13 = scmp.lt.u32.totalorder %s769_s5, %s816_s4 }
 0x11b   : > { %p590_p0 = scmp.lt.u32.totalorder %s588_s13, %s584_s9  ;;  %p592_p2 = scmp.lt.u32.totalorder %s584_s9, %s769_s5 }
 0x11c   : > { %p586_p11 = pnand %p585_p10, %p707_p5 }
 0x11d   : > { %p591_p1 = por %p590_p0, %p589_p13 }
 0x11e   : > { %p587_p12 = pneg %p586_p11 }
 0x11f   : > { %p593_p3 = por %p592_p2, %p591_p1 }
 0x121   : > { %p594_p4 = pnand %p593_p3, %p587_p12 }
 0x123   : > { %597 = shalt.err (!%p594_p4)
}
 0x124   : > { %493 = dma.vmem_to_hbm [thread:$0]  (%p707_p5), %s771_s28, 32, %s769_s5, %s332_s6  }
 0x125 PF: > { %p503_p7 = scmp.ge.s32.totalorder %s636_s18, 2  ;;  %s373_s23 = sand.u32 1, %s624_s15  }
 0x126   : > { %s374_s20 = scalar_lea.sflag [#allocation3], %s373_s23 }
 0x127   : > { %p497_p8 = pnand %p503_p7, %p711_p6 }
 0x129   : > { %615 = dma.done.wait (!%p497_p8), %s374_s20, 128  }
 0x12a   : > { %617 = vsyncadd (!%p497_p8), %s374_s20, 4294967168  ;;  %s383_s27 = scalar_lea.sflag [#allocation5], %s373_s23 }
 0x12b   : > { %619 = dma.done.wait (!%p497_p8), %s383_s27, 32  }
 0x12c   : > { %621 = vsyncadd (!%p497_p8), %s383_s27, 4294967264  ;;  %p18_p5 = scmp.ge.s32.totalorder %s694_s21, 5   ;;  %s819_s15 = smov %s628_s16 }
 0x12d   : > { %s820_s16 = smov %s632_s17  ;;  %s821_s17 = smov %s705_s24 }
 0x12e   : > { %s822_s18 = smov %s694_s21  ;;  %20 = sbr.rel (!%p18_p5) target bundleno = 5 (0x5), region = 84 }
 0x135   :  { %388 = vsyncpa [#allocation3], 1 }
 0x136   :  { %390 = vsyncpa [#allocation3 + $0x1], 1 }
 0x137   :  { %391 = vsyncpa [#allocation5], 1 }
 0x138   :  { %393 = vsyncpa [#allocation5 + $0x1], 1 }

</bundles_post_ra>
